<compile_context>
chip_gen: v7x
topology: tpu7x:2x2x1
jax: 0.10.0
libtpu: 0.0.40
codegen_flags: <defaults>
</compile_context>

<pallas_src>
import functools
import math

import jax
import jax.numpy as jnp
from jax.experimental import pallas as pl
from jax.experimental.pallas import tpu as pltpu

_LANE = 128


def _round_up(x, m):
    return (x + m - 1) // m * m


def _pow2_tile(requested, upper):
    """Largest power-of-two multiple of 128 <= min(requested, round_up(upper, 128))."""
    cap = max(_LANE, min(_round_up(int(requested), _LANE), _round_up(int(upper), _LANE)))
    t = _LANE
    while t * 2 <= cap:
        t *= 2
    return t


def _vmem_budget_bytes():
    """Generation-aware scoped-VMEM budget with headroom for the compiler."""
    try:
        cap = int(pltpu.get_tpu_info().vmem_capacity_bytes)
    except Exception:
        cap = 64 * 1024 * 1024  # v7x-safe fallback
    return max((cap * 3) // 4, 16 * 1024 * 1024)


def _agg_vmem_need(tile_m, tile_k, f_out_p, n_p, adj_bytes, dt_bytes, resident):
    """Working set of the aggregate pass (double buffers + resident output)."""
    base = (
        2 * tile_m * tile_k * adj_bytes      # adj double buffer (dominant stream)
        + 2 * tile_m * f_out_p * 4           # f32 output block (resident across k)
        + 2 * 8 * f_out_p * 4                # bias (sublane-padded)
    )
    if resident:
        sup = 2 * n_p * f_out_p * dt_bytes   # fully VMEM-resident support
    else:
        sup = 2 * tile_k * f_out_p * dt_bytes
    return base + sup


# --------------------- Kernel 1: support = X @ W ---------------------
def _support_kernel(x_ref, w_ref, o_ref):
    o_ref[...] = jnp.dot(
        x_ref[...], w_ref[...], preferred_element_type=jnp.float32
    ).astype(o_ref.dtype)


# --------------- Kernel 2: out = adj @ support + bias ----------------
def _aggregate_streamed_kernel(adj_ref, sup_ref, b_ref, o_ref):
    """support streamed per reduction step; accumulate directly into f32 o_ref."""
    k = pl.program_id(1)

    @pl.when(k == 0)
    def _():
        o_ref[...] = jnp.zeros_like(o_ref)

    o_ref[...] += jnp.dot(
        adj_ref[...], sup_ref[...], preferred_element_type=jnp.float32
    )

    @pl.when(k == pl.num_programs(1) - 1)
    def _():
        o_ref[...] += b_ref[...]


def _make_aggregate_resident_kernel(tile_k):
    """support fully VMEM-resident (fetched once); slice the k-th row band."""

    def kernel(adj_ref, sup_ref, b_ref, o_ref):
        k = pl.program_id(1)

        @pl.when(k == 0)
        def _():
            o_ref[...] = jnp.zeros_like(o_ref)

        start = pl.multiple_of(k * tile_k, tile_k)
        o_ref[...] += jnp.dot(
            adj_ref[...],
            sup_ref[pl.ds(start, tile_k), :],
            preferred_element_type=jnp.float32,
        )

        @pl.when(k == pl.num_programs(1) - 1)
        def _():
            o_ref[...] += b_ref[...]

    return kernel


# ------------------------- host-side wrappers -------------------------
def prepare_gcn_inputs(x, adj, weight, bias, *, compute_dtype=jnp.bfloat16,
                       adj_dtype=None, adj_tile=1024):
    """One-time pad + cast of all operands (hoisted out of the per-call path).

    Returns (arrays, static) where arrays = (x_p, adj_p, w_p, b_p) and static
    is a dict of python ints for gcn_forward_padded.
    """
    n, f_in = x.shape
    f_out = weight.shape[1]
    if adj_dtype is None:
        adj_dtype = compute_dtype

    f_in_p = _round_up(f_in, _LANE)
    f_out_p = _round_up(f_out, _LANE)

    adj_bytes = jnp.dtype(adj_dtype).itemsize
    dt_bytes = jnp.dtype(compute_dtype).itemsize
    budget = _vmem_budget_bytes()

    # Reduction tile (adj columns): power-of-two multiple of 128, shrunk until
    # even the streamed-support working set fits the VMEM budget.
    tile_k = _pow2_tile(adj_tile, n)
    while tile_k > _LANE and _agg_vmem_need(
        tile_k, tile_k, f_out_p, _round_up(n, tile_k), adj_bytes, dt_bytes, False
    ) > budget:
        tile_k //= 2

    n_p = _round_up(n, tile_k)

    # Row tile: start equal to tile_k, halve so num_m >= 2 where possible
    # (v7x megacore gets both TensorCores busy on the "parallel" row axis).
    tile_m = tile_k
    while tile_m > _LANE and (n_p // tile_m) < 2:
        tile_m //= 2

    dt = compute_dtype
    f32 = jnp.float32

    x_p = jnp.zeros((n_p, f_in_p), dt).at[:n, :f_in].set(x.astype(dt))
    w_p = jnp.zeros((f_in_p, f_out_p), dt).at[:f_in, :f_out].set(weight.astype(dt))
    adj_p = jnp.zeros((n_p, n_p), adj_dtype).at[:n, :n].set(adj.astype(adj_dtype))
    b_p = jnp.zeros((1, f_out_p), f32).at[0, :f_out].set(bias.astype(f32))

    static = dict(n=n, f_out=f_out, tile_m=tile_m, tile_k=tile_k)
    return (x_p, adj_p, w_p, b_p), static


def gcn_forward_padded(x_p, adj_p, w_p, b_p, *, n, f_out, tile_m, tile_k):
    """Hot path: two pallas_calls on pre-padded / pre-cast operands."""
    n_p, f_in_p = x_p.shape
    f_out_p = w_p.shape[1]
    num_m = n_p // tile_m
    num_k = n_p // tile_k

    dt = x_p.dtype
    dt_bytes = jnp.dtype(dt).itemsize
    adj_bytes = jnp.dtype(adj_p.dtype).itemsize
    budget = _vmem_budget_bytes()

    # ---- pass 1: support = X @ W (row-tiled, trivially parallel) ----
    need1 = (2 * tile_m * f_in_p * dt_bytes
             + 2 * f_in_p * f_out_p * dt_bytes
             + 2 * tile_m * f_out_p * dt_bytes)
    vmem1 = int(min(max(2 * need1, 16 * 1024 * 1024), budget))

    support = pl.pallas_call(
        _support_kernel,
        out_shape=jax.ShapeDtypeStruct((n_p, f_out_p), dt),
        grid=(num_m,),
        in_specs=[
            pl.BlockSpec((tile_m, f_in_p), lambda i: (i, 0)),
            pl.BlockSpec((f_in_p, f_out_p), lambda i: (0, 0)),
        ],
        out_specs=pl.BlockSpec((tile_m, f_out_p), lambda i: (i, 0)),
        compiler_params=pltpu.CompilerParams(
            dimension_semantics=("parallel",),
            vmem_limit_bytes=vmem1,
        ),
    )(x_p, w_p)

    # ---- pass 2: out = adj @ support + bias ----
    resident_need = _agg_vmem_need(tile_m, tile_k, f_out_p, n_p,
                                   adj_bytes, dt_bytes, resident=True)
    support_resident = resident_need <= budget

    if support_resident:
        need2 = resident_need
        kernel2 = _make_aggregate_resident_kernel(tile_k)
        sup_spec = pl.BlockSpec((n_p, f_out_p), lambda i, k: (0, 0))  # fetched once
    else:
        need2 = _agg_vmem_need(tile_m, tile_k, f_out_p, n_p,
                               adj_bytes, dt_bytes, resident=False)
        kernel2 = _aggregate_streamed_kernel
        sup_spec = pl.BlockSpec((tile_k, f_out_p), lambda i, k: (k, 0))

    vmem2 = int(min(max(2 * need2, 16 * 1024 * 1024), budget))

    out_p = pl.pallas_call(
        kernel2,
        out_shape=jax.ShapeDtypeStruct((n_p, f_out_p), jnp.float32),
        grid=(num_m, num_k),
        in_specs=[
            pl.BlockSpec((tile_m, tile_k), lambda i, k: (i, k)),  # adj (dominant stream)
            sup_spec,                                             # support
            pl.BlockSpec((1, f_out_p), lambda i, k: (0, 0)),      # bias
        ],
        out_specs=pl.BlockSpec((tile_m, f_out_p), lambda i, k: (i, 0)),
        compiler_params=pltpu.CompilerParams(
            dimension_semantics=("parallel", "arbitrary"),
            vmem_limit_bytes=vmem2,
        ),
    )(adj_p, support, b_p)

    return out_p[:n, :f_out]


def gcn_forward(x, adj, weight, bias, *, compute_dtype=jnp.bfloat16, adj_tile=1024):
    """Convenience one-shot wrapper (pads + runs). For repeated calls, use
    prepare_gcn_inputs() once and gcn_forward_padded() in the hot loop."""
    arrays, static = prepare_gcn_inputs(
        x, adj, weight, bias, compute_dtype=compute_dtype, adj_tile=adj_tile
    )
    return gcn_forward_padded(*arrays, **static)


def make_params(key, in_features, out_features):
    """Deterministic re-implementation of GraphConvolution.reset_parameters:
    uniform(-stdv, stdv) with stdv = 1/sqrt(out_features)."""
    stdv = 1.0 / math.sqrt(out_features)
    kw, kb = jax.random.split(key)
    weight = jax.random.uniform(
        kw, (in_features, out_features), jnp.float32, minval=-stdv, maxval=stdv
    )
    bias = jax.random.uniform(
        kb, (out_features,), jnp.float32, minval=-stdv, maxval=stdv
    )
    return weight, bias


if __name__ == "__main__":
    # Small, module-consistent shapes: N nodes, in_features -> out_features.
    N, F_IN, F_OUT = 64, 32, 16

    key = jax.random.PRNGKey(0)
    k_x, k_adj, k_params = jax.random.split(key, 3)

    x = jax.random.normal(k_x, (N, F_IN), jnp.float32)

    # Deterministic symmetric, row-normalized adjacency (dense; spmm == mm math).
    a = (jax.random.uniform(k_adj, (N, N)) < 0.1).astype(jnp.float32)
    a = jnp.maximum(a, a.T) + jnp.eye(N, dtype=jnp.float32)  # self loops
    deg = jnp.sum(a, axis=1, keepdims=True)
    adj = a / deg

    weight, bias = make_params(k_params, F_IN, F_OUT)

    # Pad/cast ONCE (hoisted out of the per-call path), jit only the hot path.
    arrays, static = prepare_gcn_inputs(x, adj, weight, bias)
    fwd = jax.jit(functools.partial(gcn_forward_padded, **static))

    out = fwd(*arrays)
    out = jax.block_until_ready(out)

    # Reference 1: same bf16 input quantization the kernel uses (tight match).
    bf = jnp.bfloat16
    hi = jax.lax.Precision.HIGHEST
    x_q = x.astype(bf).astype(jnp.float32)
    w_q = weight.astype(bf).astype(jnp.float32)
    adj_q = adj.astype(bf).astype(jnp.float32)
    support_q = jnp.dot(x_q, w_q, precision=hi).astype(bf).astype(jnp.float32)
    ref_q = jnp.dot(adj_q, support_q, precision=hi) + bias[None, :]

    # Reference 2: true f32 forward of the torch module (loose match — the
    # kernel streams adj/support in bf16; flagged per review).
    ref_f32 = jnp.dot(adj, jnp.dot(x, weight, precision=hi), precision=hi) + bias[None, :]

    assert out.shape == (N, F_OUT)
    assert jnp.allclose(out, ref_q, atol=1e-3, rtol=1e-3), float(
        jnp.max(jnp.abs(out - ref_q))
    )
    assert jnp.allclose(out, ref_f32, atol=5e-2, rtol=5e-2), float(
        jnp.max(jnp.abs(out - ref_f32))
    )

    print("KERNEL_OK")
</pallas_src>

<mosaic_0001>
module attributes {stable_mosaic.version = 11 : i64} {
  func.func @kernel(%arg0: i32, %arg1: i32, %arg2: memref<128x128xbf16, #tpu.memory_space<vmem>>, %arg3: memref<128x128xbf16, #tpu.memory_space<vmem>>, %arg4: memref<1x128xf32, #tpu.memory_space<vmem>>, %arg5: memref<128x128xf32, #tpu.memory_space<vmem>>) attributes {dimension_semantics = [#tpu.dimension_semantics<parallel>, #tpu.dimension_semantics<arbitrary>], iteration_bounds = array<i64: 1, 1>, scalar_prefetch = 0 : i64, scratch_operands = 0 : i64, tpu.core_type = #tpu.core_type<tc>, window_params = [{transform_indices = @transform_0, window_bounds = array<i64: 128, 128>}, {pipeline_mode = #tpu.pipeline_mode<synchronous>, transform_indices = @transform_1, window_bounds = array<i64: 128, 128>}, {pipeline_mode = #tpu.pipeline_mode<synchronous>, transform_indices = @transform_2, window_bounds = array<i64: 1, 128>}, {transform_indices = @transform_3, window_bounds = array<i64: 128, 128>}]} {
    %c0_i32 = arith.constant 0 : i32
    %0 = arith.cmpi eq, %arg1, %c0_i32 : i32
    %1 = arith.extui %0 : i1 to i32
    %c0_i32_0 = arith.constant 0 : i32
    %2 = arith.cmpi ne, %1, %c0_i32_0 : i32
    scf.if %2 {
      %cst_9 = arith.constant 0.000000e+00 : f32
      %15 = vector.broadcast %cst_9 : f32 to vector<128x128xf32>
      %c0_10 = arith.constant 0 : index
      %c0_11 = arith.constant 0 : index
      %16 = vector.load %arg5[%c0_10, %c0_11] : memref<128x128xf32, #tpu.memory_space<vmem>>, vector<128x128xf32>
      tpu.vector_store %arg5[%c0_10, %c0_11], %15 {strides = array<i32>} : memref<128x128xf32, #tpu.memory_space<vmem>>, vector<128x128xf32>,
    } else {
    }
    %c128_i32 = arith.constant 128 : i32
    %3 = arith.muli %arg1, %c128_i32 : i32
    %4 = tpu.assume_multiple %3, 128 : i32
    %c0 = arith.constant 0 : index
    %c0_1 = arith.constant 0 : index
    %5 = vector.load %arg5[%c0, %c0_1] : memref<128x128xf32, #tpu.memory_space<vmem>>, vector<128x128xf32>
    %c0_2 = arith.constant 0 : index
    %c0_3 = arith.constant 0 : index
    %6 = vector.load %arg2[%c0_2, %c0_3] : memref<128x128xbf16, #tpu.memory_space<vmem>>, vector<128x128xbf16>
    %7 = arith.index_cast %4 : i32 to index
    %c0_4 = arith.constant 0 : index
    %8 = vector.load %arg3[%7, %c0_4] : memref<128x128xbf16, #tpu.memory_space<vmem>>, vector<128x128xbf16>
    %cst = arith.constant dense<0.000000e+00> : vector<128x128xf32>
    %9 = tpu.matmul %6, %8, %cst {dimension_numbers = #tpu.dot_dimension_numbers<[1], [0], [0], [1], [0, 0, 1, 1], [], []>} : vector<128x128xbf16>, vector<128x128xbf16>, vector<128x128xf32> -> vector<128x128xf32>
    %10 = arith.addf %5, %9 : vector<128x128xf32>
    %c0_5 = arith.constant 0 : index
    %c0_6 = arith.constant 0 : index
    %11 = vector.load %arg5[%c0_5, %c0_6] : memref<128x128xf32, #tpu.memory_space<vmem>>, vector<128x128xf32>
    tpu.vector_store %arg5[%c0_5, %c0_6], %10 {strides = array<i32>} : memref<128x128xf32, #tpu.memory_space<vmem>>, vector<128x128xf32>,
    %c0_i32_7 = arith.constant 0 : i32
    %12 = arith.cmpi eq, %arg1, %c0_i32_7 : i32
    %13 = arith.extui %12 : i1 to i32
    %c0_i32_8 = arith.constant 0 : i32
    %14 = arith.cmpi ne, %13, %c0_i32_8 : i32
    scf.if %14 {
      %c0_9 = arith.constant 0 : index
      %c0_10 = arith.constant 0 : index
      %15 = vector.load %arg5[%c0_9, %c0_10] : memref<128x128xf32, #tpu.memory_space<vmem>>, vector<128x128xf32>
      %c0_11 = arith.constant 0 : index
      %c0_12 = arith.constant 0 : index
      %16 = vector.load %arg4[%c0_11, %c0_12] : memref<1x128xf32, #tpu.memory_space<vmem>>, vector<1x128xf32>
      %17 = vector.broadcast %16 : vector<1x128xf32> to vector<128x128xf32>
      %18 = arith.addf %15, %17 : vector<128x128xf32>
      %c0_13 = arith.constant 0 : index
      %c0_14 = arith.constant 0 : index
      %19 = vector.load %arg5[%c0_13, %c0_14] : memref<128x128xf32, #tpu.memory_space<vmem>>, vector<128x128xf32>
      tpu.vector_store %arg5[%c0_13, %c0_14], %18 {strides = array<i32>} : memref<128x128xf32, #tpu.memory_space<vmem>>, vector<128x128xf32>,
    } else {
    }
    return
  }
  func.func @transform_0(%arg0: i32, %arg1: i32) -> (i32, i32) {
    %c0_i32 = arith.constant 0 : i32
    return %arg0, %arg1 : i32, i32
  }
  func.func @transform_1(%arg0: i32, %arg1: i32) -> (i32, i32) {
    %c0_i32 = arith.constant 0 : i32
    %c0_i32_0 = arith.constant 0 : i32
    %c0_i32_1 = arith.constant 0 : i32
    return %c0_i32, %c0_i32_0 : i32, i32
  }
  func.func @transform_2(%arg0: i32, %arg1: i32) -> (i32, i32) {
    %c0_i32 = arith.constant 0 : i32
    %c0_i32_0 = arith.constant 0 : i32
    %c0_i32_1 = arith.constant 0 : i32
    return %c0_i32, %c0_i32_0 : i32, i32
  }
  func.func @transform_3(%arg0: i32, %arg1: i32) -> (i32, i32) {
    %c0_i32 = arith.constant 0 : i32
    %c0_i32_0 = arith.constant 0 : i32
    return %arg0, %c0_i32 : i32, i32
  }
}

module attributes {stable_mosaic.version = 11 : i64} {
  func.func @_support_kernel(%arg0: i32, %arg1: memref<128x128xbf16, #tpu.memory_space<vmem>>, %arg2: memref<128x128xbf16, #tpu.memory_space<vmem>>, %arg3: memref<128x128xbf16, #tpu.memory_space<vmem>>) attributes {dimension_semantics = [#tpu.dimension_semantics<parallel>], iteration_bounds = array<i64: 1>, scalar_prefetch = 0 : i64, scratch_operands = 0 : i64, tpu.core_type = #tpu.core_type<tc>, window_params = [{transform_indices = @transform_0, window_bounds = array<i64: 128, 128>}, {pipeline_mode = #tpu.pipeline_mode<synchronous>, transform_indices = @transform_1, window_bounds = array<i64: 128, 128>}, {transform_indices = @transform_2, window_bounds = array<i64: 128, 128>}]} {
    %c0 = arith.constant 0 : index
    %c0_0 = arith.constant 0 : index
    %0 = vector.load %arg1[%c0, %c0_0] : memref<128x128xbf16, #tpu.memory_space<vmem>>, vector<128x128xbf16>
    %c0_1 = arith.constant 0 : index
    %c0_2 = arith.constant 0 : index
    %1 = vector.load %arg2[%c0_1, %c0_2] : memref<128x128xbf16, #tpu.memory_space<vmem>>, vector<128x128xbf16>
    %cst = arith.constant dense<0.000000e+00> : vector<128x128xf32>
    %2 = tpu.matmul %0, %1, %cst {dimension_numbers = #tpu.dot_dimension_numbers<[1], [0], [0], [1], [0, 0, 1, 1], [], []>} : vector<128x128xbf16>, vector<128x128xbf16>, vector<128x128xf32> -> vector<128x128xf32>
    %3 = arith.truncf %2 : vector<128x128xf32> to vector<128x128xbf16>
    %c0_3 = arith.constant 0 : index
    %c0_4 = arith.constant 0 : index
    %4 = vector.load %arg3[%c0_3, %c0_4] : memref<128x128xbf16, #tpu.memory_space<vmem>>, vector<128x128xbf16>
    tpu.vector_store %arg3[%c0_3, %c0_4], %3 {strides = array<i32>} : memref<128x128xbf16, #tpu.memory_space<vmem>>, vector<128x128xbf16>,
    return
  }
  func.func @transform_0(%arg0: i32) -> (i32, i32) {
    %c0_i32 = arith.constant 0 : i32
    %c0_i32_0 = arith.constant 0 : i32
    return %arg0, %c0_i32 : i32, i32
  }
  func.func @transform_1(%arg0: i32) -> (i32, i32) {
    %c0_i32 = arith.constant 0 : i32
    %c0_i32_0 = arith.constant 0 : i32
    %c0_i32_1 = arith.constant 0 : i32
    return %c0_i32, %c0_i32_0 : i32, i32
  }
  func.func @transform_2(%arg0: i32) -> (i32, i32) {
    %c0_i32 = arith.constant 0 : i32
    %c0_i32_0 = arith.constant 0 : i32
    return %arg0, %c0_i32 : i32, i32
  }
}

</mosaic_0001>

<bundles_post_ra>
// kernel: gcn_forward_padded.3
= control target key start
LH: loop header
LB: loop body
LE: loop exit
PB: predicated region body
PF: predicated region fallthrough
CT: control target
= control target key end

     0   :  { %s594_s1 = inlined_call_operand.vmem [shape: bf16[128,128], index: 1, kind: input, shape index: {}]   ;;  %s595_s0 = inlined_call_operand.vmem [shape: bf16[128,128], index: 0, kind: input, shape index: {}]   ;;  %s596_s2 = inlined_call_operand.vmem [shape: f32[1,128], index: 2, kind: input, shape index: {}]   ;;  %s597_s3 = inlined_call_operand.vmem [shape: f32[128,128], index: 3, kind: output, shape index: {}]  }
   0x1   :  { %v459_v0 = vld [vmem:[%s594_s1] sm:$0xff]   ;;  %v460_v1 = vld [vmem:[%s594_s1 + $0x8] sm:$0xff]   ;;  %v461_v2 = vld [vmem:[%s594_s1 + $0x10] sm:$0xff]  }
   0x2   :  { %410 = vmatprep.subr.bf16.mxu0 %v459_v0  ;;  %442 = vmatprep.subr.bf16.mxu1 %v459_v0  ;;  %v462_v3 = vld [vmem:[%s594_s1 + $0x18] sm:$0xff]   ;;  %v467_v4 = vld [vmem:[%s595_s0] sm:$0xff]   ;;  %v464_v7 = vld [vmem:[%s594_s1 + $0x28] sm:$0xff]  }
   0x3   :  { %411 = vmatpush3.bf16.msra.mxu0 %v459_v0  ;;  %450 = vmatpush3.bf16.msra.mxu1 %v459_v0  ;;  %v468_v5 = vld [vmem:[%s595_s0 + $0x20] sm:$0xff]   ;;  %v465_v8 = vld [vmem:[%s594_s1 + $0x30] sm:$0xff]   ;;  %v466_v9 = vld [vmem:[%s594_s1 + $0x38] sm:$0xff]  }
   0x4   :  { %412 = vmatprep.subr.bf16.mxu0 %v460_v1  ;;  %443 = vmatprep.subr.bf16.mxu1 %v460_v1  ;;  %v463_v6 = vld [vmem:[%s594_s1 + $0x20] sm:$0xff]   ;;  %v469_v10 = vld [vmem:[%s595_s0 + $0x8] sm:$0xff]   ;;  %v471_v12 = vld [vmem:[%s595_s0 + $0x10] sm:$0xff]  }
   0x5   :  { %426 = vmatprep.mubr.bf16.mxu0 %v467_v4  ;;  %434 = vmatprep.mubr.bf16.mxu1 %v468_v5  ;;  %v470_v11 = vld [vmem:[%s595_s0 + $0x28] sm:$0xff]   ;;  %v472_v13 = vld [vmem:[%s595_s0 + $0x30] sm:$0xff]   ;;  %v473_v14 = vld [vmem:[%s595_s0 + $0x18] sm:$0xff]  }
   0x6   :  { %v474_v15 = vld [vmem:[%s595_s0 + $0x38] sm:$0xff]   ;;  %v393_v17 = vld [vmem:[%s596_s2] ss:$0 sm:$0xff] }
   0x7   :  { %413 = vmatpush3.bf16.msra.mxu0 %v460_v1  ;;  %451 = vmatpush3.bf16.msra.mxu1 %v460_v1 }
   0x8   :  { %414 = vmatprep.subr.bf16.mxu0 %v461_v2  ;;  %444 = vmatprep.subr.bf16.mxu1 %v461_v2 }
   0xb   :  { %415 = vmatpush3.bf16.msra.mxu0 %v461_v2  ;;  %452 = vmatpush3.bf16.msra.mxu1 %v461_v2 }
   0xc   :  { %416 = vmatprep.subr.bf16.mxu0 %v462_v3  ;;  %445 = vmatprep.subr.bf16.mxu1 %v462_v3 }
   0xf   :  { %417 = vmatpush3.bf16.msra.mxu0 %v462_v3  ;;  %453 = vmatpush3.bf16.msra.mxu1 %v462_v3 }
  0x10   :  { %418 = vmatprep.subr.bf16.mxu0 %v463_v6  ;;  %446 = vmatprep.subr.bf16.mxu1 %v463_v6 }
  0x13   :  { %419 = vmatpush3.bf16.msra.mxu0 %v463_v6  ;;  %454 = vmatpush3.bf16.msra.mxu1 %v463_v6 }
  0x14   :  { %420 = vmatprep.subr.bf16.mxu0 %v464_v7  ;;  %447 = vmatprep.subr.bf16.mxu1 %v464_v7 }
  0x17   :  { %421 = vmatpush3.bf16.msra.mxu0 %v464_v7  ;;  %455 = vmatpush3.bf16.msra.mxu1 %v464_v7 }
  0x18   :  { %422 = vmatprep.subr.bf16.mxu0 %v465_v8  ;;  %448 = vmatprep.subr.bf16.mxu1 %v465_v8 }
  0x1b   :  { %423 = vmatpush3.bf16.msra.mxu0 %v465_v8  ;;  %456 = vmatpush3.bf16.msra.mxu1 %v465_v8 }
  0x1c   :  { %424 = vmatprep.subr.bf16.mxu0 %v466_v9  ;;  %449 = vmatprep.subr.bf16.mxu1 %v466_v9 }
  0x1f   :  { %425 = vmatpush3.bf16.msra.mxu0 %v466_v9  ;;  %457 = vmatpush3.bf16.msra.mxu1 %v466_v9 }
  0x22   :  { %427 = vmatmul.mubr.bf16.vlgmr.msra.gmra.mrb[0].mxu0 %v469_v10  ;;  %435 = vmatmul.mubr.bf16.vlgmr.msra.gmra.mrb[0].mxu1 %v470_v11 }
  0x23   :  { %430 = vmatprep.mubr.bf16.mxu0 %v471_v12  ;;  %438 = vmatprep.mubr.bf16.mxu1 %v472_v13 }
  0x2a   :  { %431 = vmatmul.mubr.bf16.gmra.mrb[4].mxu0 %v473_v14  ;;  %439 = vmatmul.mubr.bf16.gmra.mrb[4].mxu1 %v474_v15 }
  0xf5   :  { %v428_v16 = vpop.f32.mrb[0].mxu0  ;;  %v436_v18 = vpop.f32.mrb[0].mxu1 }
  0xf6   :  { %v218_v19 = vpop.f32.mrb[1].mxu0  ;;  %v250_v20 = vpop.f32.mrb[1].mxu1  ;;  %v341_v23 = vadd.f32 %v428_v16, %v393_v17  ;;  %v349_v24 = vadd.f32 %v436_v18, %v393_v17 }
  0xf7   :  { %v429_v21 = vpop.f32.mrb[2].mxu0  ;;  %v437_v22 = vpop.f32.mrb[2].mxu1  ;;  %v339_v27 = vadd.f32 %v393_v17, %v218_v19  ;;  %v347_v28 = vadd.f32 %v393_v17, %v250_v20 }
  0xf8   :  { %v221_v25 = vpop.f32.mrb[3].mxu0  ;;  %v253_v26 = vpop.f32.mrb[3].mxu1  ;;  %357 = vst [vmem:[%s597_s3 + $0x10] sm:$0xff] %v341_v23  ;;  %365 = vst [vmem:[%s597_s3 + $0x50] sm:$0xff] %v349_v24  ;;  %v342_v29 = vadd.f32 %v429_v21, %v393_v17  ;;  %v350_v30 = vadd.f32 %v437_v22, %v393_v17 }
  0xf9   :  { %355 = vst [vmem:[%s597_s3] sm:$0xff] %v339_v27  ;;  %363 = vst [vmem:[%s597_s3 + $0x40] sm:$0xff] %v347_v28  ;;  %v340_v31 = vadd.f32 %v393_v17, %v221_v25  ;;  %v348_v32 = vadd.f32 %v393_v17, %v253_v26 }
  0xfa   :  { %358 = vst [vmem:[%s597_s3 + $0x18] sm:$0xff] %v342_v29  ;;  %366 = vst [vmem:[%s597_s3 + $0x58] sm:$0xff] %v350_v30 }
  0xfb   :  { %356 = vst [vmem:[%s597_s3 + $0x8] sm:$0xff] %v340_v31  ;;  %364 = vst [vmem:[%s597_s3 + $0x48] sm:$0xff] %v348_v32 }
  0xfd   :  { %v432_v33 = vpop.f32.mrb[4].mxu0  ;;  %v440_v34 = vpop.f32.mrb[4].mxu1 }
  0xfe   :  { %v234_v35 = vpop.f32.mrb[5].mxu0  ;;  %v266_v36 = vpop.f32.mrb[5].mxu1  ;;  %v345_v39 = vadd.f32 %v432_v33, %v393_v17  ;;  %v353_v40 = vadd.f32 %v440_v34, %v393_v17 }
  0xff   :  { %v433_v37 = vpop.f32.mrb[6].mxu0  ;;  %v441_v38 = vpop.f32.mrb[6].mxu1  ;;  %v343_v43 = vadd.f32 %v393_v17, %v234_v35  ;;  %v351_v44 = vadd.f32 %v393_v17, %v266_v36 }
 0x100   :  { %v237_v41 = vpop.f32.mrb[7].mxu0  ;;  %v269_v42 = vpop.f32.mrb[7].mxu1  ;;  %361 = vst [vmem:[%s597_s3 + $0x30] sm:$0xff] %v345_v39  ;;  %369 = vst [vmem:[%s597_s3 + $0x70] sm:$0xff] %v353_v40  ;;  %v346_v45 = vadd.f32 %v433_v37, %v393_v17  ;;  %v354_v46 = vadd.f32 %v441_v38, %v393_v17 }
 0x101   :  { %359 = vst [vmem:[%s597_s3 + $0x20] sm:$0xff] %v343_v43  ;;  %367 = vst [vmem:[%s597_s3 + $0x60] sm:$0xff] %v351_v44  ;;  %v344_v47 = vadd.f32 %v393_v17, %v237_v41  ;;  %v352_v48 = vadd.f32 %v393_v17, %v269_v42 }
 0x102   :  { %362 = vst [vmem:[%s597_s3 + $0x38] sm:$0xff] %v346_v45  ;;  %370 = vst [vmem:[%s597_s3 + $0x78] sm:$0xff] %v354_v46 }
 0x103   :  { %360 = vst [vmem:[%s597_s3 + $0x28] sm:$0xff] %v344_v47  ;;  %368 = vst [vmem:[%s597_s3 + $0x68] sm:$0xff] %v352_v48 }

// kernel: gcn_forward_padded.2
= control target key start
LH: loop header
LB: loop body
LE: loop exit
PB: predicated region body
PF: predicated region fallthrough
CT: control target
= control target key end

     0   :  { %7 = vsyncpa [#allocation3], 0  ;;  %s645_s0 = inlined_call_operand.hbm [shape: bf16[128,128], index: 0, kind: input, shape index: {}]   ;;  %s646_s1 = inlined_call_operand.hbm [shape: bf16[128,128], index: 1, kind: input, shape index: {}]   ;;  %s647_s2 = inlined_call_operand.vmem [shape: bf16[128,128], index: 2, kind: output, shape index: {}]  }
   0x1   :  { %8 = vsyncpa [#allocation5], 0  ;;  %s578_s9 = smov [#allocation2]   ;;  %s530_s13 = scalar_lea.hbm %s645_s0, 1024 }
   0x2   :  { %s14_s10 = sshll.u32 %s578_s9, 4  ;;  %p531_p0 = scmp.ne.s32.totalorder %s645_s0, %s530_s13  ;;  %s15_s10 = int_to_ptr.vmem [resolvable:$true] %s14_s10 }
   0x3   :  { %p534_p1 = scmp.lt.u32.totalorder %s530_s13, %s645_s0 }
   0x5   :  { %p536_p2 = pnand %p534_p1, %p531_p0 }
   0x7   :  { %539 = shalt.err (!%p536_p2)
}
   0x8   :  { %s540_s18 = scalar_lea.vmem %s15_s10, 1024  ;;  %p545_p4 = scmp.lt.s32.totalorder %s15_s10, %s15_s10 }
   0x9   :  { %p541_p3 = scmp.ne.s32.totalorder %s15_s10, %s540_s18  ;;  %p546_p5 = scmp.lt.s32.totalorder %s540_s18, %s540_s18 }
   0xb   :  { %p547_p6 = por %p546_p5, %p545_p4 }
   0xd   :  { %p548_p7 = pnand %p547_p6, %p541_p3 }
   0xf   :  { %551 = shalt.err (!%p548_p7)
}
  0x10   :  { %s579_s19 = smov 64   ;;  %s580_s20 = smov 4  }
  0x11   :  { %20 = dma.hbm_to_vmem [thread:$0]  %s645_s0, 1024, %s15_s10, [#allocation3], %s579_s19, %s579_s19, %s580_s20  }
  0x12   :  { %s581_s23 = smov [#allocation4]   ;;  %s552_s27 = scalar_lea.hbm %s646_s1, 1024 }
  0x13   :  { %s26_s24 = sshll.u32 %s581_s23, 4  ;;  %p553_p8 = scmp.ne.s32.totalorder %s646_s1, %s552_s27  ;;  %s27_s24 = int_to_ptr.vmem [resolvable:$true] %s26_s24 }
  0x14   :  { %p556_p9 = scmp.lt.u32.totalorder %s552_s27, %s646_s1 }
  0x16   :  { %p558_p10 = pnand %p556_p9, %p553_p8 }
  0x18   :  { %561 = shalt.err (!%p558_p10)
}
  0x19   :  { %s562_s4 = scalar_lea.vmem %s27_s24, 1024  ;;  %p567_p12 = scmp.lt.s32.totalorder %s27_s24, %s27_s24 }
  0x1a   :  { %p563_p11 = scmp.ne.s32.totalorder %s27_s24, %s562_s4  ;;  %p568_p13 = scmp.lt.s32.totalorder %s562_s4, %s562_s4 }
  0x1c   :  { %p569_p0 = por %p568_p13, %p567_p12 }
  0x1e   :  { %p570_p1 = pnand %p569_p0, %p563_p11 }
  0x20   :  { %573 = shalt.err (!%p570_p1)
}
  0x21   :  { %32 = dma.hbm_to_vmem [thread:$0]  %s646_s1, 1024, %s27_s24, [#allocation5], %s579_s19, %s579_s19, %s580_s20  }
  0x22   :  { %574 = dma.done.wait [#allocation3], 1024  }
  0x23   :  { %575 = vsyncadd [#allocation3], 4294966272 }
  0x24   :  { %576 = dma.done.wait [#allocation5], 1024  }
  0x25   :  { %577 = vsyncadd [#allocation5], 4294966272  ;;  %v514_v0 = vld [vmem:[#allocation4] sm:$0xff]   ;;  %v515_v1 = vld [vmem:[#allocation4 + $0x8] sm:$0xff]  }
  0x26   :  { %462 = vmatprep.subr.bf16.mxu0 %v514_v0  ;;  %494 = vmatprep.subr.bf16.mxu1 %v514_v0  ;;  %v516_v2 = vld [vmem:[#allocation4 + $0x10] sm:$0xff]   ;;  %v517_v3 = vld [vmem:[#allocation4 + $0x18] sm:$0xff]   ;;  %v522_v4 = vld [vmem:[#allocation2] sm:$0xff]  }
  0x27   :  { %463 = vmatpush3.bf16.msra.mxu0 %v514_v0  ;;  %502 = vmatpush3.bf16.msra.mxu1 %v514_v0  ;;  %v523_v5 = vld [vmem:[#allocation2 + $0x20] sm:$0xff]   ;;  %v519_v7 = vld [vmem:[#allocation4 + $0x28] sm:$0xff]   ;;  %v520_v8 = vld [vmem:[#allocation4 + $0x30] sm:$0xff]  }
  0x28   :  { %464 = vmatprep.subr.bf16.mxu0 %v515_v1  ;;  %495 = vmatprep.subr.bf16.mxu1 %v515_v1  ;;  %v518_v6 = vld [vmem:[#allocation4 + $0x20] sm:$0xff]   ;;  %v521_v9 = vld [vmem:[#allocation4 + $0x38] sm:$0xff]   ;;  %v524_v10 = vld [vmem:[#allocation2 + $0x8] sm:$0xff]  }
  0x29   :  { %478 = vmatprep.mubr.bf16.mxu0 %v522_v4  ;;  %486 = vmatprep.mubr.bf16.mxu1 %v523_v5  ;;  %v525_v11 = vld [vmem:[#allocation2 + $0x28] sm:$0xff]   ;;  %v526_v12 = vld [vmem:[#allocation2 + $0x10] sm:$0xff]   ;;  %v528_v14 = vld [vmem:[#allocation2 + $0x18] sm:$0xff]  }
  0x2a   :  { %v527_v13 = vld [vmem:[#allocation2 + $0x30] sm:$0xff]   ;;  %v529_v15 = vld [vmem:[#allocation2 + $0x38] sm:$0xff]  }
  0x2b   :  { %465 = vmatpush3.bf16.msra.mxu0 %v515_v1  ;;  %503 = vmatpush3.bf16.msra.mxu1 %v515_v1 }
  0x2c   :  { %466 = vmatprep.subr.bf16.mxu0 %v516_v2  ;;  %496 = vmatprep.subr.bf16.mxu1 %v516_v2 }
  0x2f   :  { %467 = vmatpush3.bf16.msra.mxu0 %v516_v2  ;;  %504 = vmatpush3.bf16.msra.mxu1 %v516_v2 }
  0x30   :  { %468 = vmatprep.subr.bf16.mxu0 %v517_v3  ;;  %497 = vmatprep.subr.bf16.mxu1 %v517_v3 }
  0x33   :  { %469 = vmatpush3.bf16.msra.mxu0 %v517_v3  ;;  %505 = vmatpush3.bf16.msra.mxu1 %v517_v3 }
  0x34   :  { %470 = vmatprep.subr.bf16.mxu0 %v518_v6  ;;  %498 = vmatprep.subr.bf16.mxu1 %v518_v6 }
  0x37   :  { %471 = vmatpush3.bf16.msra.mxu0 %v518_v6  ;;  %506 = vmatpush3.bf16.msra.mxu1 %v518_v6 }
  0x38   :  { %472 = vmatprep.subr.bf16.mxu0 %v519_v7  ;;  %499 = vmatprep.subr.bf16.mxu1 %v519_v7 }
  0x3b   :  { %473 = vmatpush3.bf16.msra.mxu0 %v519_v7  ;;  %507 = vmatpush3.bf16.msra.mxu1 %v519_v7 }
  0x3c   :  { %474 = vmatprep.subr.bf16.mxu0 %v520_v8  ;;  %500 = vmatprep.subr.bf16.mxu1 %v520_v8 }
  0x3f   :  { %475 = vmatpush3.bf16.msra.mxu0 %v520_v8  ;;  %508 = vmatpush3.bf16.msra.mxu1 %v520_v8 }
  0x40   :  { %476 = vmatprep.subr.bf16.mxu0 %v521_v9  ;;  %501 = vmatprep.subr.bf16.mxu1 %v521_v9 }
  0x43   :  { %477 = vmatpush3.bf16.msra.mxu0 %v521_v9  ;;  %509 = vmatpush3.bf16.msra.mxu1 %v521_v9 }
  0x46   :  { %479 = vmatmul.mubr.bf16.vlgmr.msra.gmra.mrb[0].mxu0 %v524_v10  ;;  %487 = vmatmul.mubr.bf16.vlgmr.msra.gmra.mrb[0].mxu1 %v525_v11 }
  0x47   :  { %482 = vmatprep.mubr.bf16.mxu0 %v526_v12  ;;  %490 = vmatprep.mubr.bf16.mxu1 %v527_v13 }
  0x4e   :  { %483 = vmatmul.mubr.bf16.gmra.mrb[4].mxu0 %v528_v14  ;;  %491 = vmatmul.mubr.bf16.gmra.mrb[4].mxu1 %v529_v15 }
 0x119   :  { %v480_v16 = vpop.f32.mrb[0].mxu0  ;;  %v488_v17 = vpop.f32.mrb[0].mxu1 }
 0x11a   :  { %v202_v18 = vpop.f32.mrb[1].mxu0  ;;  %v234_v19 = vpop.f32.mrb[1].mxu1 }
 0x11b   :  { %v481_v20 = vpop.f32.mrb[2].mxu0  ;;  %v489_v21 = vpop.f32.mrb[2].mxu1 }
 0x11c   :  { %v407_v22 = vpack.c.bf16 %v481_v20, %v480_v16  ;;  %v427_v23 = vpack.c.bf16 %v489_v21, %v488_v17  ;;  %v205_v24 = vpop.f32.mrb[3].mxu0  ;;  %v237_v25 = vpop.f32.mrb[3].mxu1 }
 0x11d   :  { %v402_v26 = vpack.c.bf16 %v205_v24, %v202_v18  ;;  %v422_v27 = vpack.c.bf16 %v237_v25, %v234_v19 }
 0x11e   :  { %439 = vst [vmem:[%s647_s2 + $0x8] sm:$0xff] %v407_v22   ;;  %443 = vst [vmem:[%s647_s2 + $0x28] sm:$0xff] %v427_v23  }
 0x11f   :  { %403 = vst [vmem:[%s647_s2] sm:$0xff] %v402_v26   ;;  %442 = vst [vmem:[%s647_s2 + $0x20] sm:$0xff] %v422_v27  }
 0x121   :  { %v484_v28 = vpop.f32.mrb[4].mxu0  ;;  %v492_v29 = vpop.f32.mrb[4].mxu1 }
 0x122   :  { %v218_v30 = vpop.f32.mrb[5].mxu0  ;;  %v250_v31 = vpop.f32.mrb[5].mxu1 }
 0x123   :  { %v485_v32 = vpop.f32.mrb[6].mxu0  ;;  %v493_v33 = vpop.f32.mrb[6].mxu1 }
 0x124   :  { %v417_v34 = vpack.c.bf16 %v485_v32, %v484_v28  ;;  %v437_v35 = vpack.c.bf16 %v493_v33, %v492_v29  ;;  %v221_v36 = vpop.f32.mrb[7].mxu0  ;;  %v253_v37 = vpop.f32.mrb[7].mxu1 }
 0x125   :  { %v412_v38 = vpack.c.bf16 %v221_v36, %v218_v30  ;;  %v432_v39 = vpack.c.bf16 %v253_v37, %v250_v31 }
 0x126   :  { %441 = vst [vmem:[%s647_s2 + $0x18] sm:$0xff] %v417_v34   ;;  %445 = vst [vmem:[%s647_s2 + $0x38] sm:$0xff] %v437_v35  }
 0x127   :  { %440 = vst [vmem:[%s647_s2 + $0x10] sm:$0xff] %v412_v38   ;;  %444 = vst [vmem:[%s647_s2 + $0x30] sm:$0xff] %v432_v39  }
 0x128   :  { %349 = vsyncpa [#allocation3], 1 }
 0x129   :  { %350 = vsyncpa [#allocation5], 1 }

</bundles_post_ra>
